<compile_context>
chip_gen: v7x
topology: tpu7x:2x2x1
jax: 0.10.0
libtpu: 0.0.40
codegen_flags: <defaults>
</compile_context>

<pallas_src>
import functools

import jax
import jax.numpy as jnp
from jax.experimental import pallas as pl
from jax.experimental.pallas import tpu as pltpu


def _dann_tile_kernel(*refs, tile_rows, total_rows, has_weights, ragged):
    """One batch tile of both halves: MLP discriminator + logit-space weighted-BCE partial sum."""
    if has_weights:
        (fs_ref, ft_ref, w1_ref, b1_ref, w2_ref, b2_ref,
         ws_ref, wt_ref, o_ref) = refs
    else:
        (fs_ref, ft_ref, w1_ref, b1_ref, w2_ref, b2_ref, o_ref) = refs
        ws_ref = wt_ref = None

    i = pl.program_id(0)

    w1 = w1_ref[...]                              # (D, H) resident (single-buffered)
    b1 = b1_ref[...].astype(jnp.float32)          # (1, H)
    w2_row = w2_ref[...].astype(jnp.float32)      # (1, H) second Linear weight as a row
    b2 = b2_ref[...].astype(jnp.float32)          # (1, 1)

    def per_row_bce(f_tile, label_is_one):
        # First Linear on the MXU (bf16-native if features are bf16), f32 accumulate, ReLU on VPU.
        h = jnp.dot(f_tile, w1, preferred_element_type=jnp.float32) + b1
        h = jnp.maximum(h, 0.0)
        # Second Linear has out_features == 1: elementwise mul + lane reduce (VPU/XLU) instead of
        # a <1%-utilization MXU matmul.
        logits = jnp.sum(h * w2_row, axis=-1, keepdims=True) + b2        # (tile, 1)
        # BCE with sigmoid folded in (logit space):
        #   target=1: -log(sigmoid(z))   = softplus(-z)
        #   target=0: -log(1-sigmoid(z)) = softplus(+z)
        z = -logits if label_is_one else logits
        sp = jnp.maximum(z, 0.0) + jnp.log1p(jnp.exp(-jnp.abs(z)))       # stable softplus
        # NOTE: torch clamps log terms at -100 after prob-space sigmoid; this logit-space clamp
        # matches except in the extreme-saturation band |z| in (~88, 100) where it is *more* exact.
        return jnp.minimum(sp, 100.0)

    bce_s = per_row_bce(fs_ref[...], True)     # source rows: label 1
    bce_t = per_row_bce(ft_ref[...], False)    # target rows: label 0

    if has_weights:
        contrib_s = ws_ref[...].astype(jnp.float32) * bce_s
        contrib_t = wt_ref[...].astype(jnp.float32) * bce_t
    else:
        contrib_s, contrib_t = bce_s, bce_t

    if ragged:
        # Last tile may extend past B: mask invalid rows in-kernel (no HBM jnp.pad round-trip).
        row = i * tile_rows + jax.lax.broadcasted_iota(jnp.int32, (tile_rows, 1), 0)
        valid = row < total_rows
        contrib_s = jnp.where(valid, contrib_s, 0.0)
        contrib_t = jnp.where(valid, contrib_t, 0.0)

    partial = jnp.sum(contrib_s) + jnp.sum(contrib_t)
    # Lane-dense per-tile partial; grid axis is "parallel" so each tile owns its own output block.
    o_ref[...] = jnp.broadcast_to(partial, o_ref.shape).astype(jnp.float32)


def _vmem_limit_bytes():
    """Per-generation scoped-VMEM limit: ~75% of physical, capped at 96 MiB (v7x lands at 48 MiB)."""
    cap = 64 * 1024 * 1024  # conservative fallback (v7x per-TC physical VMEM)
    try:
        info = pltpu.get_tpu_info()
        cap = int(getattr(info, "vmem_capacity_bytes", cap)) or cap
    except Exception:
        pass
    return min(int(0.75 * cap), 96 * 1024 * 1024)


def _pick_tile(batch, feat_dim, hidden_dim, itemsize, has_weights, vmem_limit, max_tile_rows):
    """Size the batch tile from the real VMEM budget (feature streams dominate)."""
    d_pad = -(-feat_dim // 128) * 128     # lane padding of the (tile, D) blocks
    h_pad = -(-hidden_dim // 128) * 128
    per_row = 4 * d_pad * itemsize        # f_s + f_t, double-buffered
    per_row += 2 * 4 * h_pad              # f32 hidden activations (both halves)
    per_row += 4 * 128 * 4                # (tile, 1) f32 temporaries, lane-padded
    if has_weights:
        per_row += 2 * 2 * 128 * 4        # lane-padded (tile,1) weight streams, double-buffered
    d_sub = -(-feat_dim // 8) * 8
    resident = 2 * d_sub * h_pad * itemsize + (1 << 16)   # w1 (worst case 2 bufs) + small blocks
    budget = int(0.5 * vmem_limit) - resident
    tile = max(8, budget // per_row)
    tile = int(min(tile, max_tile_rows))
    if tile >= batch:
        return batch, 1, False            # single tile; block dim == full dim so any B is legal
    tile = max(8, (tile // 8) * 8)        # multi-tile: sublane-aligned blocks
    num_tiles = -(-batch // tile)
    return tile, num_tiles, (batch % tile) != 0


def domain_adversarial_loss(f_s, f_t, w1, b1, w2, b2, w_s=None, w_t=None,
                            max_tile_rows=2048):
    """Wrapper (glue only): dtype plumbing, tile sizing, BlockSpecs, pallas_call, final reduce."""
    B, D = f_s.shape
    assert f_t.shape == (B, D), "torch.chunk(2) semantics assume equal source/target batch"
    H = w1.shape[-1]

    # bf16 fast path: if features are bf16, keep them bf16 and cast w1 so the MXU runs natively
    # (halves the dominant HBM stream when the caller supplies bf16 features).
    if f_s.dtype == jnp.bfloat16 or f_t.dtype == jnp.bfloat16:
        f_s = f_s.astype(jnp.bfloat16)
        f_t = f_t.astype(jnp.bfloat16)
        w1 = w1.astype(jnp.bfloat16)
    else:
        f_t = f_t.astype(f_s.dtype)
        w1 = w1.astype(f_s.dtype)

    has_weights = (w_s is not None) or (w_t is not None)

    vmem_limit = _vmem_limit_bytes()
    itemsize = jnp.dtype(f_s.dtype).itemsize
    tile, num_tiles, ragged = _pick_tile(B, D, H, itemsize, has_weights, vmem_limit, max_tile_rows)

    b1v = jnp.asarray(b1, jnp.float32).reshape(1, H)
    w2v = jnp.asarray(w2, jnp.float32).reshape(1, H)
    b2v = jnp.asarray(b2, jnp.float32).reshape(1, 1)

    args = [f_s, f_t, w1, b1v, w2v, b2v]
    if has_weights:
        ws = (jnp.ones((B, 1), jnp.float32) if w_s is None
              else jnp.asarray(w_s, jnp.float32).reshape(B, 1))
        wt = (jnp.ones((B, 1), jnp.float32) if w_t is None
              else jnp.asarray(w_t, jnp.float32).reshape(B, 1))
        args += [ws, wt]

    kernel = functools.partial(
        _dann_tile_kernel, tile_rows=tile, total_rows=B,
        has_weights=has_weights, ragged=ragged)

    def build_and_call(single_buffer_params):
        def param_spec(shape):
            idx = lambda i: (0,) * len(shape)
            if single_buffer_params:
                # Constant index_map -> no need for double buffering of resident parameters.
                return pl.BlockSpec(shape, idx, pipeline_mode=pl.Buffered(1))
            return pl.BlockSpec(shape, idx)

        in_specs = [
            pl.BlockSpec((tile, D), lambda i: (i, 0)),     # f_s tile (streamed)
            pl.BlockSpec((tile, D), lambda i: (i, 0)),     # f_t tile (streamed)
            param_spec((D, H)),                            # w1 resident
            param_spec((1, H)),                            # b1 resident
            param_spec((1, H)),                            # w2 (row) resident
            param_spec((1, 1)),                            # b2 resident
        ]
        if has_weights:
            in_specs += [
                pl.BlockSpec((tile, 1), lambda i: (i, 0)),
                pl.BlockSpec((tile, 1), lambda i: (i, 0)),
            ]

        return pl.pallas_call(
            kernel,
            out_shape=jax.ShapeDtypeStruct((num_tiles, 1, 128), jnp.float32),
            grid_spec=pltpu.PrefetchScalarGridSpec(
                num_scalar_prefetch=0,
                grid=(num_tiles,),
                in_specs=in_specs,
                out_specs=pl.BlockSpec((1, 1, 128), lambda i: (i, 0, 0)),
            ),
            compiler_params=pltpu.CompilerParams(
                dimension_semantics=("parallel",),   # independent tiles -> both TCs on v7x
                vmem_limit_bytes=vmem_limit,
            ),
        )(*args)

    try:
        partials = build_and_call(single_buffer_params=True)
    except Exception:
        # Fallback if single-buffered pipeline_mode is not supported by this JAX/Mosaic version.
        partials = build_and_call(single_buffer_params=False)

    # 0.5 * (mean_s + mean_t) == total_weighted_sum / (2 * B); finalize in XLA (tiny reduce).
    return partials[:, 0, 0].sum() * (0.5 / B)


def _reference_loss(f_s, f_t, w1, b1, w2, b2, w_s=None, w_t=None):
    """Plain-JAX reference mirroring the PyTorch module (probability-space BCE, -100 log clamp)."""
    f = jnp.concatenate([f_s, f_t], axis=0).astype(jnp.float32)
    h = jnp.maximum(f @ jnp.asarray(w1, jnp.float32) + jnp.asarray(b1, jnp.float32), 0.0)
    d = jax.nn.sigmoid(h @ jnp.asarray(w2, jnp.float32) + jnp.asarray(b2, jnp.float32))
    b = f_s.shape[0]
    d_s, d_t = d[:b], d[b:]
    if w_s is None:
        w_s = jnp.ones((b, 1), jnp.float32)
    if w_t is None:
        w_t = jnp.ones((b, 1), jnp.float32)
    bce_s = jnp.mean(jnp.asarray(w_s, jnp.float32).reshape(b, 1)
                     * -jnp.maximum(jnp.log(d_s), -100.0))
    bce_t = jnp.mean(jnp.asarray(w_t, jnp.float32).reshape(b, 1)
                     * -jnp.maximum(jnp.log(1.0 - d_t), -100.0))
    return 0.5 * (bce_s + bce_t)


if __name__ == "__main__":
    B, D, H = 8, 32, 32  # batch per domain, feature dim, discriminator hidden dim

    key = jax.random.PRNGKey(0)
    k_fs, k_ft, k_w1, k_b1, k_w2, k_b2, k_ws, k_wt = jax.random.split(key, 8)

    # deterministic synthetic inputs / parameters (no checkpoint loading)
    f_s = jax.random.normal(k_fs, (B, D), jnp.float32)
    f_t = jax.random.normal(k_ft, (B, D), jnp.float32) + 0.5

    w1 = jax.random.normal(k_w1, (D, H), jnp.float32) * 0.1   # Linear(D, H) weight (in, out)
    b1 = jax.random.normal(k_b1, (H,), jnp.float32) * 0.01
    w2 = jax.random.normal(k_w2, (H, 1), jnp.float32) * 0.1   # Linear(H, 1) weight (in, out)
    b2 = jax.random.normal(k_b2, (1,), jnp.float32) * 0.01

    # 1) unweighted, single batch tile
    loss = jax.block_until_ready(domain_adversarial_loss(f_s, f_t, w1, b1, w2, b2))
    ref = _reference_loss(f_s, f_t, w1, b1, w2, b2)
    assert jnp.isfinite(loss), loss
    assert jnp.allclose(loss, ref, rtol=1e-5, atol=1e-5), (loss, ref)

    # 2) weighted BCE path (w_s / w_t provided)
    w_s = jax.random.uniform(k_ws, (B, 1), jnp.float32, minval=0.5, maxval=1.5)
    w_t = jax.random.uniform(k_wt, (B, 1), jnp.float32, minval=0.5, maxval=1.5)
    loss_w = jax.block_until_ready(
        domain_adversarial_loss(f_s, f_t, w1, b1, w2, b2, w_s, w_t))
    ref_w = _reference_loss(f_s, f_t, w1, b1, w2, b2, w_s, w_t)
    assert jnp.isfinite(loss_w), loss_w
    assert jnp.allclose(loss_w, ref_w, rtol=1e-5, atol=1e-5), (loss_w, ref_w)

    # 3) multi-tile parallel grid (forced small tile)
    B2 = 32
    k2a, k2b = jax.random.split(jax.random.PRNGKey(1), 2)
    f_s2 = jax.random.normal(k2a, (B2, D), jnp.float32)
    f_t2 = jax.random.normal(k2b, (B2, D), jnp.float32) - 0.25
    loss2 = jax.block_until_ready(
        domain_adversarial_loss(f_s2, f_t2, w1, b1, w2, b2, max_tile_rows=8))
    ref2 = _reference_loss(f_s2, f_t2, w1, b1, w2, b2)
    assert jnp.isfinite(loss2), loss2
    assert jnp.allclose(loss2, ref2, rtol=1e-5, atol=1e-5), (loss2, ref2)

    # 4) ragged batch (B not a multiple of the tile) + weights: exercises the in-kernel iota mask
    B3 = 20
    k3a, k3b, k3c, k3d = jax.random.split(jax.random.PRNGKey(2), 4)
    f_s3 = jax.random.normal(k3a, (B3, D), jnp.float32)
    f_t3 = jax.random.normal(k3b, (B3, D), jnp.float32) + 0.3
    w_s3 = jax.random.uniform(k3c, (B3, 1), jnp.float32, minval=0.5, maxval=1.5)
    w_t3 = jax.random.uniform(k3d, (B3, 1), jnp.float32, minval=0.5, maxval=1.5)
    loss3 = jax.block_until_ready(
        domain_adversarial_loss(f_s3, f_t3, w1, b1, w2, b2, w_s3, w_t3, max_tile_rows=8))
    ref3 = _reference_loss(f_s3, f_t3, w1, b1, w2, b2, w_s3, w_t3)
    assert jnp.isfinite(loss3), loss3
    assert jnp.allclose(loss3, ref3, rtol=1e-5, atol=1e-5), (loss3, ref3)

    # 5) bf16 feature fast path (native-rate MXU, halved feature HBM stream)
    loss_bf = jax.block_until_ready(
        domain_adversarial_loss(f_s.astype(jnp.bfloat16), f_t.astype(jnp.bfloat16),
                                w1, b1, w2, b2))
    ref_bf = _reference_loss(f_s.astype(jnp.bfloat16).astype(jnp.float32),
                             f_t.astype(jnp.bfloat16).astype(jnp.float32),
                             w1, b1, w2, b2)
    assert jnp.isfinite(loss_bf), loss_bf
    assert jnp.allclose(loss_bf, ref_bf, rtol=2e-2, atol=2e-2), (loss_bf, ref_bf)

    print("KERNEL_OK")
</pallas_src>

<mosaic_0001>
module attributes {stable_mosaic.version = 11 : i64} {
  func.func @_dann_tile_kernel(%arg0: i32, %arg1: memref<8x32xf32, #tpu.memory_space<vmem>>, %arg2: memref<8x32xf32, #tpu.memory_space<vmem>>, %arg3: memref<32x32xf32, #tpu.memory_space<vmem>>, %arg4: memref<1x32xf32, #tpu.memory_space<vmem>>, %arg5: memref<1x32xf32, #tpu.memory_space<vmem>>, %arg6: memref<1x1xf32, #tpu.memory_space<vmem>>, %arg7: memref<1x1x128xf32, #tpu.memory_space<vmem>>) attributes {dimension_semantics = [#tpu.dimension_semantics<parallel>], iteration_bounds = array<i64: 1>, scalar_prefetch = 0 : i64, scratch_operands = 0 : i64, tpu.core_type = #tpu.core_type<tc>, window_params = [{transform_indices = @transform_0, window_bounds = array<i64: 8, 32>}, {transform_indices = @transform_1, window_bounds = array<i64: 8, 32>}, {pipeline_mode = #tpu.pipeline_mode<synchronous>, transform_indices = @transform_2, window_bounds = array<i64: 32, 32>}, {pipeline_mode = #tpu.pipeline_mode<synchronous>, transform_indices = @transform_3, window_bounds = array<i64: 1, 32>}, {pipeline_mode = #tpu.pipeline_mode<synchronous>, transform_indices = @transform_4, window_bounds = array<i64: 1, 32>}, {pipeline_mode = #tpu.pipeline_mode<synchronous>, transform_indices = @transform_5, window_bounds = array<i64: 1, 1>}, {transform_indices = @transform_6, window_bounds = array<i64: 1, 1, 128>}]} {
    %c0 = arith.constant 0 : index
    %c0_0 = arith.constant 0 : index
    %0 = vector.load %arg3[%c0, %c0_0] : memref<32x32xf32, #tpu.memory_space<vmem>>, vector<32x32xf32>
    %c0_1 = arith.constant 0 : index
    %c0_2 = arith.constant 0 : index
    %1 = vector.load %arg4[%c0_1, %c0_2] : memref<1x32xf32, #tpu.memory_space<vmem>>, vector<1x32xf32>
    %c0_3 = arith.constant 0 : index
    %c0_4 = arith.constant 0 : index
    %2 = vector.load %arg5[%c0_3, %c0_4] : memref<1x32xf32, #tpu.memory_space<vmem>>, vector<1x32xf32>
    %c0_5 = arith.constant 0 : index
    %c0_6 = arith.constant 0 : index
    %3 = vector.load %arg6[%c0_5, %c0_6] : memref<1x1xf32, #tpu.memory_space<vmem>>, vector<1x1xf32>
    %c0_7 = arith.constant 0 : index
    %c0_8 = arith.constant 0 : index
    %4 = vector.load %arg1[%c0_7, %c0_8] : memref<8x32xf32, #tpu.memory_space<vmem>>, vector<8x32xf32>
    %cst = arith.constant dense<0.000000e+00> : vector<8x32xf32>
    %5 = tpu.matmul %4, %0, %cst {dimension_numbers = #tpu.dot_dimension_numbers<[1], [0], [0], [1], [0, 0, 1, 1], [], []>} : vector<8x32xf32>, vector<32x32xf32>, vector<8x32xf32> -> vector<8x32xf32>
    %6 = vector.broadcast %1 : vector<1x32xf32> to vector<8x32xf32>
    %7 = arith.addf %5, %6 : vector<8x32xf32>
    %cst_9 = arith.constant 0.000000e+00 : f32
    %8 = vector.broadcast %cst_9 : f32 to vector<8x32xf32>
    %9 = arith.maximumf %7, %8 : vector<8x32xf32>
    %10 = vector.broadcast %2 : vector<1x32xf32> to vector<8x32xf32>
    %11 = arith.mulf %9, %10 : vector<8x32xf32>
    %cst_10 = arith.constant dense<0.000000e+00> : vector<8xf32>
    %12 = vector.multi_reduction <add>, %11, %cst_10 [1] : vector<8x32xf32> to vector<8xf32>
    %13 = vector.shape_cast %12 : vector<8xf32> to vector<8x1xf32>
    %14 = vector.broadcast %3 : vector<1x1xf32> to vector<8x1xf32>
    %15 = arith.addf %13, %14 : vector<8x1xf32>
    %cst_11 = arith.constant 0.000000e+00 : f32
    %16 = vector.broadcast %cst_11 : f32 to vector<8x1xf32>
    %17 = arith.subf %16, %15 : vector<8x1xf32>
    %cst_12 = arith.constant 0.000000e+00 : f32
    %18 = vector.broadcast %cst_12 : f32 to vector<8x1xf32>
    %19 = arith.maximumf %17, %18 : vector<8x1xf32>
    %20 = math.absf %17 : vector<8x1xf32>
    %cst_13 = arith.constant 0.000000e+00 : f32
    %21 = vector.broadcast %cst_13 : f32 to vector<8x1xf32>
    %22 = arith.subf %21, %20 : vector<8x1xf32>
    %23 = math.exp %22 : vector<8x1xf32>
    %24 = math.log1p %23 : vector<8x1xf32>
    %25 = arith.addf %19, %24 : vector<8x1xf32>
    %cst_14 = arith.constant 1.000000e+02 : f32
    %26 = vector.broadcast %cst_14 : f32 to vector<8x1xf32>
    %27 = arith.minimumf %25, %26 : vector<8x1xf32>
    %c0_15 = arith.constant 0 : index
    %c0_16 = arith.constant 0 : index
    %28 = vector.load %arg2[%c0_15, %c0_16] : memref<8x32xf32, #tpu.memory_space<vmem>>, vector<8x32xf32>
    %cst_17 = arith.constant dense<0.000000e+00> : vector<8x32xf32>
    %29 = tpu.matmul %28, %0, %cst_17 {dimension_numbers = #tpu.dot_dimension_numbers<[1], [0], [0], [1], [0, 0, 1, 1], [], []>} : vector<8x32xf32>, vector<32x32xf32>, vector<8x32xf32> -> vector<8x32xf32>
    %30 = vector.broadcast %1 : vector<1x32xf32> to vector<8x32xf32>
    %31 = arith.addf %29, %30 : vector<8x32xf32>
    %cst_18 = arith.constant 0.000000e+00 : f32
    %32 = vector.broadcast %cst_18 : f32 to vector<8x32xf32>
    %33 = arith.maximumf %31, %32 : vector<8x32xf32>
    %34 = vector.broadcast %2 : vector<1x32xf32> to vector<8x32xf32>
    %35 = arith.mulf %33, %34 : vector<8x32xf32>
    %cst_19 = arith.constant dense<0.000000e+00> : vector<8xf32>
    %36 = vector.multi_reduction <add>, %35, %cst_19 [1] : vector<8x32xf32> to vector<8xf32>
    %37 = vector.shape_cast %36 : vector<8xf32> to vector<8x1xf32>
    %38 = vector.broadcast %3 : vector<1x1xf32> to vector<8x1xf32>
    %39 = arith.addf %37, %38 : vector<8x1xf32>
    %cst_20 = arith.constant 0.000000e+00 : f32
    %40 = vector.broadcast %cst_20 : f32 to vector<8x1xf32>
    %41 = arith.maximumf %39, %40 : vector<8x1xf32>
    %42 = math.absf %39 : vector<8x1xf32>
    %cst_21 = arith.constant 0.000000e+00 : f32
    %43 = vector.broadcast %cst_21 : f32 to vector<8x1xf32>
    %44 = arith.subf %43, %42 : vector<8x1xf32>
    %45 = math.exp %44 : vector<8x1xf32>
    %46 = math.log1p %45 : vector<8x1xf32>
    %47 = arith.addf %41, %46 : vector<8x1xf32>
    %cst_22 = arith.constant 1.000000e+02 : f32
    %48 = vector.broadcast %cst_22 : f32 to vector<8x1xf32>
    %49 = arith.minimumf %47, %48 : vector<8x1xf32>
    %50 = vector.shape_cast %27 : vector<8x1xf32> to vector<1x8x1xf32>
    %cst_23 = arith.constant dense<0.000000e+00> : vector<1xf32>
    %51 = vector.multi_reduction <add>, %50, %cst_23 [1, 2] : vector<1x8x1xf32> to vector<1xf32>
    %52 = vector.shape_cast %51 : vector<1xf32> to vector<1x1x1xf32>
    %53 = vector.extract %52[0, 0, 0] : f32 from vector<1x1x1xf32>
    %54 = vector.shape_cast %49 : vector<8x1xf32> to vector<1x8x1xf32>
    %cst_24 = arith.constant dense<0.000000e+00> : vector<1xf32>
    %55 = vector.multi_reduction <add>, %54, %cst_24 [1, 2] : vector<1x8x1xf32> to vector<1xf32>
    %56 = vector.shape_cast %55 : vector<1xf32> to vector<1x1x1xf32>
    %57 = vector.extract %56[0, 0, 0] : f32 from vector<1x1x1xf32>
    %58 = arith.addf %53, %57 : f32
    %59 = vector.broadcast %58 : f32 to vector<1x1x128xf32>
    %c0_25 = arith.constant 0 : index
    %c0_26 = arith.constant 0 : index
    %c0_27 = arith.constant 0 : index
    %60 = vector.load %arg7[%c0_25, %c0_26, %c0_27] : memref<1x1x128xf32, #tpu.memory_space<vmem>>, vector<1x1x128xf32>
    tpu.vector_store %arg7[%c0_25, %c0_26, %c0_27], %59 {strides = array<i32>} : memref<1x1x128xf32, #tpu.memory_space<vmem>>, vector<1x1x128xf32>,
    return
  }
  func.func @transform_0(%arg0: i32) -> (i32, i32) {
    %c0_i32 = arith.constant 0 : i32
    %c0_i32_0 = arith.constant 0 : i32
    return %arg0, %c0_i32 : i32, i32
  }
  func.func @transform_1(%arg0: i32) -> (i32, i32) {
    %c0_i32 = arith.constant 0 : i32
    %c0_i32_0 = arith.constant 0 : i32
    return %arg0, %c0_i32 : i32, i32
  }
  func.func @transform_2(%arg0: i32) -> (i32, i32) {
    %c0_i32 = arith.constant 0 : i32
    %c0_i32_0 = arith.constant 0 : i32
    %c0_i32_1 = arith.constant 0 : i32
    return %c0_i32, %c0_i32_0 : i32, i32
  }
  func.func @transform_3(%arg0: i32) -> (i32, i32) {
    %c0_i32 = arith.constant 0 : i32
    %c0_i32_0 = arith.constant 0 : i32
    %c0_i32_1 = arith.constant 0 : i32
    return %c0_i32, %c0_i32_0 : i32, i32
  }
  func.func @transform_4(%arg0: i32) -> (i32, i32) {
    %c0_i32 = arith.constant 0 : i32
    %c0_i32_0 = arith.constant 0 : i32
    %c0_i32_1 = arith.constant 0 : i32
    return %c0_i32, %c0_i32_0 : i32, i32
  }
  func.func @transform_5(%arg0: i32) -> (i32, i32) {
    %c0_i32 = arith.constant 0 : i32
    %c0_i32_0 = arith.constant 0 : i32
    %c0_i32_1 = arith.constant 0 : i32
    return %c0_i32, %c0_i32_0 : i32, i32
  }
  func.func @transform_6(%arg0: i32) -> (i32, i32, i32) {
    %c0_i32 = arith.constant 0 : i32
    %c0_i32_0 = arith.constant 0 : i32
    %c0_i32_1 = arith.constant 0 : i32
    return %arg0, %c0_i32, %c0_i32_0 : i32, i32, i32
  }
}

module attributes {stable_mosaic.version = 11 : i64} {
  func.func @_dann_tile_kernel(%arg0: i32, %arg1: memref<8x32xf32, #tpu.memory_space<vmem>>, %arg2: memref<8x32xf32, #tpu.memory_space<vmem>>, %arg3: memref<32x32xf32, #tpu.memory_space<vmem>>, %arg4: memref<1x32xf32, #tpu.memory_space<vmem>>, %arg5: memref<1x32xf32, #tpu.memory_space<vmem>>, %arg6: memref<1x1xf32, #tpu.memory_space<vmem>>, %arg7: memref<1x1x128xf32, #tpu.memory_space<vmem>>) attributes {dimension_semantics = [#tpu.dimension_semantics<parallel>], iteration_bounds = array<i64: 1>, scalar_prefetch = 0 : i64, scratch_operands = 0 : i64, tpu.core_type = #tpu.core_type<tc>, window_params = [{transform_indices = @transform_0, window_bounds = array<i64: 8, 32>}, {transform_indices = @transform_1, window_bounds = array<i64: 8, 32>}, {pipeline_mode = #tpu.pipeline_mode<synchronous>, transform_indices = @transform_2, window_bounds = array<i64: 32, 32>}, {pipeline_mode = #tpu.pipeline_mode<synchronous>, transform_indices = @transform_3, window_bounds = array<i64: 1, 32>}, {pipeline_mode = #tpu.pipeline_mode<synchronous>, transform_indices = @transform_4, window_bounds = array<i64: 1, 32>}, {pipeline_mode = #tpu.pipeline_mode<synchronous>, transform_indices = @transform_5, window_bounds = array<i64: 1, 1>}, {transform_indices = @transform_6, window_bounds = array<i64: 1, 1, 128>}]} {
    %c0 = arith.constant 0 : index
    %c0_0 = arith.constant 0 : index
    %0 = vector.load %arg3[%c0, %c0_0] : memref<32x32xf32, #tpu.memory_space<vmem>>, vector<32x32xf32>
    %c0_1 = arith.constant 0 : index
    %c0_2 = arith.constant 0 : index
    %1 = vector.load %arg4[%c0_1, %c0_2] : memref<1x32xf32, #tpu.memory_space<vmem>>, vector<1x32xf32>
    %c0_3 = arith.constant 0 : index
    %c0_4 = arith.constant 0 : index
    %2 = vector.load %arg5[%c0_3, %c0_4] : memref<1x32xf32, #tpu.memory_space<vmem>>, vector<1x32xf32>
    %c0_5 = arith.constant 0 : index
    %c0_6 = arith.constant 0 : index
    %3 = vector.load %arg6[%c0_5, %c0_6] : memref<1x1xf32, #tpu.memory_space<vmem>>, vector<1x1xf32>
    %c0_7 = arith.constant 0 : index
    %c0_8 = arith.constant 0 : index
    %4 = vector.load %arg1[%c0_7, %c0_8] : memref<8x32xf32, #tpu.memory_space<vmem>>, vector<8x32xf32>
    %cst = arith.constant dense<0.000000e+00> : vector<8x32xf32>
    %5 = tpu.matmul %4, %0, %cst {dimension_numbers = #tpu.dot_dimension_numbers<[1], [0], [0], [1], [0, 0, 1, 1], [], []>} : vector<8x32xf32>, vector<32x32xf32>, vector<8x32xf32> -> vector<8x32xf32>
    %6 = vector.broadcast %1 : vector<1x32xf32> to vector<8x32xf32>
    %7 = arith.addf %5, %6 : vector<8x32xf32>
    %cst_9 = arith.constant 0.000000e+00 : f32
    %8 = vector.broadcast %cst_9 : f32 to vector<8x32xf32>
    %9 = arith.maximumf %7, %8 : vector<8x32xf32>
    %10 = vector.broadcast %2 : vector<1x32xf32> to vector<8x32xf32>
    %11 = arith.mulf %9, %10 : vector<8x32xf32>
    %cst_10 = arith.constant dense<0.000000e+00> : vector<8xf32>
    %12 = vector.multi_reduction <add>, %11, %cst_10 [1] : vector<8x32xf32> to vector<8xf32>
    %13 = vector.shape_cast %12 : vector<8xf32> to vector<8x1xf32>
    %14 = vector.broadcast %3 : vector<1x1xf32> to vector<8x1xf32>
    %15 = arith.addf %13, %14 : vector<8x1xf32>
    %cst_11 = arith.constant 0.000000e+00 : f32
    %16 = vector.broadcast %cst_11 : f32 to vector<8x1xf32>
    %17 = arith.subf %16, %15 : vector<8x1xf32>
    %cst_12 = arith.constant 0.000000e+00 : f32
    %18 = vector.broadcast %cst_12 : f32 to vector<8x1xf32>
    %19 = arith.maximumf %17, %18 : vector<8x1xf32>
    %20 = math.absf %17 : vector<8x1xf32>
    %cst_13 = arith.constant 0.000000e+00 : f32
    %21 = vector.broadcast %cst_13 : f32 to vector<8x1xf32>
    %22 = arith.subf %21, %20 : vector<8x1xf32>
    %23 = math.exp %22 : vector<8x1xf32>
    %24 = math.log1p %23 : vector<8x1xf32>
    %25 = arith.addf %19, %24 : vector<8x1xf32>
    %cst_14 = arith.constant 1.000000e+02 : f32
    %26 = vector.broadcast %cst_14 : f32 to vector<8x1xf32>
    %27 = arith.minimumf %25, %26 : vector<8x1xf32>
    %c0_15 = arith.constant 0 : index
    %c0_16 = arith.constant 0 : index
    %28 = vector.load %arg2[%c0_15, %c0_16] : memref<8x32xf32, #tpu.memory_space<vmem>>, vector<8x32xf32>
    %cst_17 = arith.constant dense<0.000000e+00> : vector<8x32xf32>
    %29 = tpu.matmul %28, %0, %cst_17 {dimension_numbers = #tpu.dot_dimension_numbers<[1], [0], [0], [1], [0, 0, 1, 1], [], []>} : vector<8x32xf32>, vector<32x32xf32>, vector<8x32xf32> -> vector<8x32xf32>
    %30 = vector.broadcast %1 : vector<1x32xf32> to vector<8x32xf32>
    %31 = arith.addf %29, %30 : vector<8x32xf32>
    %cst_18 = arith.constant 0.000000e+00 : f32
    %32 = vector.broadcast %cst_18 : f32 to vector<8x32xf32>
    %33 = arith.maximumf %31, %32 : vector<8x32xf32>
    %34 = vector.broadcast %2 : vector<1x32xf32> to vector<8x32xf32>
    %35 = arith.mulf %33, %34 : vector<8x32xf32>
    %cst_19 = arith.constant dense<0.000000e+00> : vector<8xf32>
    %36 = vector.multi_reduction <add>, %35, %cst_19 [1] : vector<8x32xf32> to vector<8xf32>
    %37 = vector.shape_cast %36 : vector<8xf32> to vector<8x1xf32>
    %38 = vector.broadcast %3 : vector<1x1xf32> to vector<8x1xf32>
    %39 = arith.addf %37, %38 : vector<8x1xf32>
    %cst_20 = arith.constant 0.000000e+00 : f32
    %40 = vector.broadcast %cst_20 : f32 to vector<8x1xf32>
    %41 = arith.maximumf %39, %40 : vector<8x1xf32>
    %42 = math.absf %39 : vector<8x1xf32>
    %cst_21 = arith.constant 0.000000e+00 : f32
    %43 = vector.broadcast %cst_21 : f32 to vector<8x1xf32>
    %44 = arith.subf %43, %42 : vector<8x1xf32>
    %45 = math.exp %44 : vector<8x1xf32>
    %46 = math.log1p %45 : vector<8x1xf32>
    %47 = arith.addf %41, %46 : vector<8x1xf32>
    %cst_22 = arith.constant 1.000000e+02 : f32
    %48 = vector.broadcast %cst_22 : f32 to vector<8x1xf32>
    %49 = arith.minimumf %47, %48 : vector<8x1xf32>
    %50 = vector.shape_cast %27 : vector<8x1xf32> to vector<1x8x1xf32>
    %cst_23 = arith.constant dense<0.000000e+00> : vector<1xf32>
    %51 = vector.multi_reduction <add>, %50, %cst_23 [1, 2] : vector<1x8x1xf32> to vector<1xf32>
    %52 = vector.shape_cast %51 : vector<1xf32> to vector<1x1x1xf32>
    %53 = vector.extract %52[0, 0, 0] : f32 from vector<1x1x1xf32>
    %54 = vector.shape_cast %49 : vector<8x1xf32> to vector<1x8x1xf32>
    %cst_24 = arith.constant dense<0.000000e+00> : vector<1xf32>
    %55 = vector.multi_reduction <add>, %54, %cst_24 [1, 2] : vector<1x8x1xf32> to vector<1xf32>
    %56 = vector.shape_cast %55 : vector<1xf32> to vector<1x1x1xf32>
    %57 = vector.extract %56[0, 0, 0] : f32 from vector<1x1x1xf32>
    %58 = arith.addf %53, %57 : f32
    %59 = vector.broadcast %58 : f32 to vector<1x1x128xf32>
    %c0_25 = arith.constant 0 : index
    %c0_26 = arith.constant 0 : index
    %c0_27 = arith.constant 0 : index
    %60 = vector.load %arg7[%c0_25, %c0_26, %c0_27] : memref<1x1x128xf32, #tpu.memory_space<vmem>>, vector<1x1x128xf32>
    tpu.vector_store %arg7[%c0_25, %c0_26, %c0_27], %59 {strides = array<i32>} : memref<1x1x128xf32, #tpu.memory_space<vmem>>, vector<1x1x128xf32>,
    return
  }
  func.func @transform_0(%arg0: i32) -> (i32, i32) {
    %c0_i32 = arith.constant 0 : i32
    %c0_i32_0 = arith.constant 0 : i32
    return %arg0, %c0_i32 : i32, i32
  }
  func.func @transform_1(%arg0: i32) -> (i32, i32) {
    %c0_i32 = arith.constant 0 : i32
    %c0_i32_0 = arith.constant 0 : i32
    return %arg0, %c0_i32 : i32, i32
  }
  func.func @transform_2(%arg0: i32) -> (i32, i32) {
    %c0_i32 = arith.constant 0 : i32
    %c0_i32_0 = arith.constant 0 : i32
    %c0_i32_1 = arith.constant 0 : i32
    return %c0_i32, %c0_i32_0 : i32, i32
  }
  func.func @transform_3(%arg0: i32) -> (i32, i32) {
    %c0_i32 = arith.constant 0 : i32
    %c0_i32_0 = arith.constant 0 : i32
    %c0_i32_1 = arith.constant 0 : i32
    return %c0_i32, %c0_i32_0 : i32, i32
  }
  func.func @transform_4(%arg0: i32) -> (i32, i32) {
    %c0_i32 = arith.constant 0 : i32
    %c0_i32_0 = arith.constant 0 : i32
    %c0_i32_1 = arith.constant 0 : i32
    return %c0_i32, %c0_i32_0 : i32, i32
  }
  func.func @transform_5(%arg0: i32) -> (i32, i32) {
    %c0_i32 = arith.constant 0 : i32
    %c0_i32_0 = arith.constant 0 : i32
    %c0_i32_1 = arith.constant 0 : i32
    return %c0_i32, %c0_i32_0 : i32, i32
  }
  func.func @transform_6(%arg0: i32) -> (i32, i32, i32) {
    %c0_i32 = arith.constant 0 : i32
    %c0_i32_0 = arith.constant 0 : i32
    %c0_i32_1 = arith.constant 0 : i32
    return %arg0, %c0_i32, %c0_i32_0 : i32, i32, i32
  }
}

</mosaic_0001>

<bundles_post_ra>
// kernel: tpu_custom_call.1
= control target key start
LH: loop header
LB: loop body
LE: loop exit
PB: predicated region body
PF: predicated region fallthrough
CT: control target
= control target key end

     0   :  { %s591_s0 = inlined_call_operand.hbm [shape: f32[8,32], index: 0, kind: input, shape index: {}]   ;;  %s592_s1 = inlined_call_operand.hbm [shape: f32[8,32], index: 1, kind: input, shape index: {}]   ;;  %s593_s2 = inlined_call_operand.hbm [shape: f32[32,32], index: 2, kind: input, shape index: {}]   ;;  %s594_s3 = inlined_call_operand.vmem [shape: f32[1,32], index: 3, kind: input, shape index: {}]   ;;  %s595_s4 = inlined_call_operand.vmem [shape: f32[1,32], index: 4, kind: input, shape index: {}]   ;;  %s596_s5 = inlined_call_operand.<no memory space> [shape: f32[1,1], index: 5, kind: input, shape index: {}]   ;;  %s597_s6 = inlined_call_operand.hbm [shape: f32[1,1,128], index: 6, kind: output, shape index: {}]  }
   0x1   :  { %v11_v0 = vstv %s596_s5 }
   0x2   :  { %12 = vst [vmem:[#allocation2] sm:$0x1] %v11_v0 }
   0x3   :  { %13 = vsyncpa [#allocation4], 0 }
   0x4   :  { %14 = vsyncpa [#allocation7], 0 }
   0x5   :  { %15 = vsyncpa [#allocation5], 0  ;;  %s486_s23 = smov [#allocation6]   ;;  %s487_s25 = smov [#allocation3]  }
   0x6   :  { %s32_s24 = sshll.u32 %s486_s23, 4  ;;  %s22_s26 = sshll.u32 %s487_s25, 4  ;;  %s33_s24 = int_to_ptr.vmem [resolvable:$true] %s32_s24  ;;  %s23_s26 = int_to_ptr.vmem [resolvable:$true] %s22_s26 }
   0x7   :  { %s392_s29 = scalar_lea.hbm %s592_s1, 128 }
   0x8   :  { %p393_p0 = scmp.ne.s32.totalorder %s592_s1, %s392_s29  ;;  %p396_p1 = scmp.lt.u32.totalorder %s392_s29, %s592_s1 }
   0xa   :  { %p398_p2 = pnand %p396_p1, %p393_p0 }
   0xc   :  { %401 = shalt.err (!%p398_p2)
}
   0xd   :  { %s402_s9 = scalar_lea.vmem %s33_s24, 128  ;;  %p407_p4 = scmp.lt.s32.totalorder %s33_s24, %s33_s24 }
   0xe   :  { %p403_p3 = scmp.ne.s32.totalorder %s33_s24, %s402_s9  ;;  %p408_p5 = scmp.lt.s32.totalorder %s402_s9, %s402_s9 }
  0x10   :  { %p409_p6 = por %p408_p5, %p407_p4 }
  0x12   :  { %p410_p7 = pnand %p409_p6, %p403_p3 }
  0x14   :  { %413 = shalt.err (!%p410_p7)
}
  0x15   :  { %35 = dma.hbm_to_vmem [thread:$0]  %s592_s1, 128, %s33_s24, [#allocation7]  }
  0x16   :  { %s414_s14 = scalar_lea.hbm %s591_s0, 128 }
  0x17   :  { %p415_p8 = scmp.ne.s32.totalorder %s591_s0, %s414_s14  ;;  %p418_p9 = scmp.lt.u32.totalorder %s414_s14, %s591_s0 }
  0x19   :  { %p420_p10 = pnand %p418_p9, %p415_p8 }
  0x1b   :  { %423 = shalt.err (!%p420_p10)
}
  0x1c   :  { %s424_s19 = scalar_lea.vmem %s23_s26, 128  ;;  %p429_p12 = scmp.lt.s32.totalorder %s23_s26, %s23_s26 }
  0x1d   :  { %p425_p11 = scmp.ne.s32.totalorder %s23_s26, %s424_s19  ;;  %p430_p13 = scmp.lt.s32.totalorder %s424_s19, %s424_s19 }
  0x1f   :  { %p431_p0 = por %p430_p13, %p429_p12 }
  0x21   :  { %p432_p1 = pnand %p431_p0, %p425_p11 }
  0x23   :  { %435 = shalt.err (!%p432_p1)
}
  0x24   :  { %25 = dma.hbm_to_vmem [thread:$0]  %s591_s0, 128, %s23_s26, [#allocation4]  }
  0x25   :  { %s488_s21 = smov [#allocation8]   ;;  %s436_s25 = scalar_lea.hbm %s593_s2, 512 }
  0x26   :  { %s41_s22 = sshll.u32 %s488_s21, 4  ;;  %p437_p2 = scmp.ne.s32.totalorder %s593_s2, %s436_s25  ;;  %s42_s22 = int_to_ptr.vmem [resolvable:$true] %s41_s22 }
  0x27   :  { %p440_p3 = scmp.lt.u32.totalorder %s436_s25, %s593_s2 }
  0x29   :  { %p442_p4 = pnand %p440_p3, %p437_p2 }
  0x2b   :  { %445 = shalt.err (!%p442_p4)
}
  0x2c   :  { %s446_s7 = scalar_lea.vmem %s42_s22, 512  ;;  %p451_p6 = scmp.lt.s32.totalorder %s42_s22, %s42_s22 }
  0x2d   :  { %p447_p5 = scmp.ne.s32.totalorder %s42_s22, %s446_s7  ;;  %p452_p7 = scmp.lt.s32.totalorder %s446_s7, %s446_s7 }
  0x2f   :  { %p453_p8 = por %p452_p7, %p451_p6 }
  0x31   :  { %p454_p9 = pnand %p453_p8, %p447_p5 }
  0x33   :  { %457 = shalt.err (!%p454_p9)
}
  0x34   :  { %s489_s0 = smov 128   ;;  %s490_s26 = smov 8  }
  0x35   :  { %47 = dma.hbm_to_vmem [thread:$0]  %s593_s2, 512, %s42_s22, [#allocation7], %s489_s0, %s489_s0, %s490_s26  }
  0x36   :  { %480 = dma.done.wait [#allocation4], 128  }
  0x37   :  { %481 = vsyncadd [#allocation4], 4294967168 }
  0x38   :  { %482 = dma.done.wait [#allocation7], 640  }
  0x39   :  { %483 = vsyncadd [#allocation7], 4294966656  ;;  %v491_v1 = vmov 0.0|0.0   ;;  %vm492_vm0 = vmmov 0   ;;  %v493_v2 = vmov 0.0   ;;  %v63_v3 = vld [vmem:[#allocation8] sm:$0xff] }
  0x3a   :  { %359 = vmatprep.subr.bf16.mxu0 %v491_v1  ;;  %365 = vmatprep.subr.bf16.mxu1 %v491_v1  ;;  %v64_v4 = vld [vmem:[#allocation8 + $0x8] sm:$0xff]  ;;  %v65_v5 = vld [vmem:[#allocation8 + $0x10] sm:$0xff]  ;;  %v66_v7 = vld [vmem:[#allocation8 + $0x18] sm:$0xff]  ;;  %vm77_vm1 = vcmask 261120   ;;  %vm282_vm4 = vcmask 7168  }
  0x3b   :  { %345 = vmatprep.mubr.msk.f32.mxu0 %vm492_vm0, %v493_v2  ;;  %356 = vmatprep.mubr.msk.f32.mxu1 %vm492_vm0, %v493_v2  ;;  %v360_v6 = vpack.c.bf16 %v64_v4, %v63_v3  ;;  %v363_v8 = vpack.c.bf16 %v66_v7, %v65_v5  ;;  %v70_v9 = vld [vmem:[#allocation3] sm:$0xff]  ;;  %v186_v10 = vld [vmem:[#allocation6] sm:$0xff]  ;;  %v322_v11 = vld [vmem:[%s594_s3] ss:$0 sm:$0xff] }
  0x3c   :  { %v324_v18 = vld [vmem:[%s595_s4] ss:$0 sm:$0xff]  ;;  %s494_s4 = smov [#allocation9]  }
  0x3d   :  { %361 = vmatpush3.bf16.msra.mxu0 %v360_v6  ;;  %367 = vmatpush3.bf16.msra.mxu1 %v360_v6  ;;  %v325_v25 = vld [vmem:[#allocation2] ss:$0 sm:$0xff]  ;;  %s312_s12 = sshll.u32 %s494_s4, 4  ;;  %s313_s12 = int_to_ptr.vmem [resolvable:$true] %s312_s12 }
  0x3e   :  { %362 = vmatprep.subr.bf16.mxu0 %v491_v1  ;;  %368 = vmatprep.subr.bf16.mxu1 %v491_v1  ;;  %s458_s15 = scalar_lea.vmem %s313_s12, 16  ;;  %s462_s16 = scalar_lea.vmem %s313_s12, 32 }
  0x3f   :  { %p459_p10 = scmp.ne.s32.totalorder %s313_s12, %s458_s15  ;;  %p463_p11 = scmp.lt.s32.totalorder %s313_s12, %s313_s12 }
  0x40   :  { %p464_p12 = scmp.lt.s32.totalorder %s462_s16, %s458_s15 }
  0x41   :  { %364 = vmatpush3.bf16.msra.mxu0 %v363_v8  ;;  %370 = vmatpush3.bf16.msra.mxu1 %v363_v8 }
  0x42   :  { %p465_p13 = por %p464_p12, %p463_p11 }
  0x44   :  { %346 = vmatmul.mubr.msk.f32.vlgmr.msra.gmra.mrb[0].mxu0 %vm77_vm1, %v70_v9  ;;  %357 = vmatmul.mubr.msk.f32.vlgmr.msra.gmra.mrb[0].mxu1 %vm77_vm1, %v186_v10  ;;  %p466_p0 = pnand %p465_p13, %p459_p10 }
 0x117   :  { %v147_v12 = vpop.f32.mrb[0].mxu0  ;;  %v256_v13 = vpop.f32.mrb[0].mxu1 }
 0x118   :  { %v148_v14 = vadd.f32 %v322_v11, %v147_v12  ;;  %v347_v15 = vpop.f32.mrb[1].mxu0  ;;  %v257_v16 = vadd.f32 %v322_v11, %v256_v13  ;;  %v358_v17 = vpop.f32.mrb[1].mxu1 }
 0x11a   :  { %v151_v19 = vmax.f32 %v148_v14, 0.0  ;;  %v260_v20 = vmax.f32 %v257_v16, 0.0 }
 0x11c   :  { %v158_v21 = vmul.f32 %v324_v18, %v151_v19  ;;  %v261_v22 = vmul.f32 %v324_v18, %v260_v20 }
 0x11e   :  { %v159_v23 = vsel %vm77_vm1, %v158_v21, 0.0  ;;  %v262_v24 = vsel %vm77_vm1, %v261_v22, 0.0 }
 0x11f   :  { %160 = vadd.xlane.f32.xlu0 %v159_v23 }
 0x123   :  { %263 = vadd.xlane.f32.xlu0 %v262_v24 }
 0x1ac   :  { %v161_v26 = vpop.xlane.xlu0 %160 }
 0x1ad   :  { %v168_v27 = vadd.f32 %v325_v25, %v161_v26 }
 0x1af   :  { %v169_v28 = vsub.f32 0.0, %v168_v27 }
 0x1b0   :  { %v264_v29 = vpop.xlane.xlu0 %263 }
 0x1b1   :  { %v171_v30 = vand.u32 2147483647, %v169_v28  ;;  %v265_v31 = vadd.f32 %v325_v25, %v264_v29  ;;  %v170_v51 = vmax.f32 %v169_v28, 0.0 }
 0x1b3   :  { %v172_v32 = vsub.f32 0.0, %v171_v30  ;;  %v267_v33 = vand.u32 2147483647, %v265_v31  ;;  %v266_v55 = vmax.f32 %v265_v31, 0.0 }
 0x1b5   :  { %v173_v34 = vmul.f32 1.442695, %v172_v32  ;;  %v268_v35 = vsub.f32 0.0, %v267_v33 }
 0x1b7   :  { %384 = vpow2.f32 %v173_v34  ;;  %v269_v36 = vmul.f32 1.442695, %v268_v35 }
 0x1b9   :  { %386 = vpow2.f32 %v269_v36 }
 0x1c1   :  { %v385_v37 = vpop.eup %384 }
 0x1c2   :  { %v175_v38 = vadd.f32 1.0, %v385_v37  ;;  %v178_v41 = vmul.f32 -0.5, %v385_v37  ;;  %v181_v44 = vand.u32 2147483647, %v385_v37 }
 0x1c3   :  { %v387_v39 = vpop.eup %386 }
 0x1c4   :  { %388 = vlog2.f32 %v175_v38  ;;  %v271_v40 = vadd.f32 1.0, %v387_v39  ;;  %v274_v42 = vmul.f32 -0.5, %v387_v39  ;;  %v179_v43 = vadd.f32 1.0, %v178_v41 }
 0x1c5   :  { %v277_v47 = vand.u32 2147483647, %v387_v39  ;;  %vm182_vm2 = vcmp.lt.f32.partialorder %v181_v44, 0.0004427343 }
 0x1c6   :  { %390 = vlog2.f32 %v271_v40  ;;  %v275_v45 = vadd.f32 1.0, %v274_v42  ;;  %v180_v49 = vmul.f32 %v385_v37, %v179_v43 }
 0x1c7   :  { %vm278_vm3 = vcmp.lt.f32.partialorder %v277_v47, 0.0004427343 }
 0x1c8   :  { %v276_v54 = vmul.f32 %v387_v39, %v275_v45 }
 0x1ce   :  { %v389_v46 = vpop.eup %388 }
 0x1cf   :  { %v177_v48 = vmul.f32 0.6931472, %v389_v46 }
 0x1d0   :  { %v391_v50 = vpop.eup %390 }
 0x1d1   :  { %v183_v52 = vsel %vm182_vm2, %v180_v49, %v177_v48  ;;  %v273_v53 = vmul.f32 0.6931472, %v391_v50 }
 0x1d2   :  { %v184_v56 = vadd.f32 %v183_v52, %v170_v51 }
 0x1d3   :  { %v279_v57 = vsel %vm278_vm3, %v276_v54, %v273_v53 }
 0x1d4   :  { %v185_v58 = vmin.f32 %v184_v56, 100.0  ;;  %v280_v59 = vadd.f32 %v279_v57, %v266_v55 }
 0x1d6   :  { %v283_v60 = vsel %vm282_vm4, %v185_v58, 0.0  ;;  %v281_v61 = vmin.f32 %v280_v59, 100.0 }
 0x1d7   :  { %284 = vadd.xlane.f32.xlu1 %v283_v60 }
 0x1d8   :  { %v293_v62 = vsel %vm282_vm4, %v281_v61, 0.0 }
 0x1db   :  { %294 = vadd.xlane.f32.xlu1 %v293_v62 }
 0x264   :  { %v285_v63 = vpop.xlane.xlu1 %284 }
 0x265   :  { %v286_v0 = vrot.slane %v285_v63, 4 }
 0x267   :  { %v287_v1 = vadd.f32 %v286_v0, %v285_v63 }
 0x268   :  { %v295_v2 = vpop.xlane.xlu1 %294 }
 0x269   :  { %v288_v3 = vrot.slane %v287_v1, 2  ;;  %v296_v4 = vrot.slane %v295_v2, 4 }
 0x26b   :  { %v297_v5 = vadd.f32 %v296_v4, %v295_v2  ;;  %v289_v6 = vadd.f32 %v288_v3, %v287_v1 }
 0x26d   :  { %v298_v7 = vrot.slane %v297_v5, 2  ;;  %v290_v8 = vrot.slane %v289_v6, 1 }
 0x26f   :  { %v299_v9 = vadd.f32 %v298_v7, %v297_v5  ;;  %v291_v10 = vadd.f32 %v290_v8, %v289_v6 }
 0x271   :  { %371 = vpush %v291_v10  ;;  %v300_v11 = vrot.slane %v299_v9, 1 }
 0x273   :  { %v301_v12 = vadd.f32 %v300_v11, %v299_v9 }
 0x275   :  { %373 = vpush %v301_v12 }
 0x2a2   :  { %s372_s3 = spop %371 }
 0x2a6   :  { %s374_s13 = spop %373 }
 0x2a7   :  { %s303_s14 = sadd.f32 %s374_s13, %s372_s3 }
 0x2a9   :  { %v304_v13 = vstv %s303_s14 }
 0x2aa   :  { %305 = vst [vmem:[#allocation9] sm:$0x1] %v304_v13 }
 0x2ab   :  { %469 = shalt.err (!%p466_p0)
}
 0x2ac   :  { %s470_s19 = scalar_lea.hbm %s597_s6, 16 }
 0x2ad   :  { %p471_p1 = scmp.ne.s32.totalorder %s597_s6, %s470_s19  ;;  %p474_p2 = scmp.lt.u32.totalorder %s470_s19, %s597_s6 }
 0x2af   :  { %p476_p3 = pnand %p474_p2, %p471_p1 }
 0x2b1   :  { %479 = shalt.err (!%p476_p3)
}
 0x2b2   :  { %315 = dma.vmem_to_hbm [thread:$0]  %s313_s12, 16, %s597_s6, [#allocation5]  }
 0x2b3   :  { %484 = dma.done.wait [#allocation5], 16  }
 0x2b4   :  { %485 = vsyncadd [#allocation5], 4294967280 }
 0x2b5   :  { %319 = vsyncpa [#allocation4], 1 }
 0x2b6   :  { %320 = vsyncpa [#allocation7], 1 }
 0x2b7   :  { %321 = vsyncpa [#allocation5], 1 }

// kernel: tpu_custom_call.1
= control target key start
LH: loop header
LB: loop body
LE: loop exit
PB: predicated region body
PF: predicated region fallthrough
CT: control target
= control target key end

     0   :  { %s591_s0 = inlined_call_operand.hbm [shape: f32[8,32], index: 0, kind: input, shape index: {}]   ;;  %s592_s1 = inlined_call_operand.hbm [shape: f32[8,32], index: 1, kind: input, shape index: {}]   ;;  %s593_s2 = inlined_call_operand.hbm [shape: f32[32,32], index: 2, kind: input, shape index: {}]   ;;  %s594_s3 = inlined_call_operand.vmem [shape: f32[1,32], index: 3, kind: input, shape index: {}]   ;;  %s595_s4 = inlined_call_operand.vmem [shape: f32[1,32], index: 4, kind: input, shape index: {}]   ;;  %s596_s5 = inlined_call_operand.<no memory space> [shape: f32[1,1], index: 5, kind: input, shape index: {}]   ;;  %s597_s6 = inlined_call_operand.hbm [shape: f32[1,1,128], index: 6, kind: output, shape index: {}]  }
   0x1   :  { %v11_v0 = vstv %s596_s5 }
   0x2   :  { %12 = vst [vmem:[#allocation2] sm:$0x1] %v11_v0 }
   0x3   :  { %13 = vsyncpa [#allocation4], 0 }
   0x4   :  { %14 = vsyncpa [#allocation7], 0 }
   0x5   :  { %15 = vsyncpa [#allocation5], 0  ;;  %s486_s23 = smov [#allocation6]   ;;  %s487_s25 = smov [#allocation3]  }
   0x6   :  { %s32_s24 = sshll.u32 %s486_s23, 4  ;;  %s22_s26 = sshll.u32 %s487_s25, 4  ;;  %s33_s24 = int_to_ptr.vmem [resolvable:$true] %s32_s24  ;;  %s23_s26 = int_to_ptr.vmem [resolvable:$true] %s22_s26 }
   0x7   :  { %s392_s29 = scalar_lea.hbm %s592_s1, 128 }
   0x8   :  { %p393_p0 = scmp.ne.s32.totalorder %s592_s1, %s392_s29  ;;  %p396_p1 = scmp.lt.u32.totalorder %s392_s29, %s592_s1 }
   0xa   :  { %p398_p2 = pnand %p396_p1, %p393_p0 }
   0xc   :  { %401 = shalt.err (!%p398_p2)
}
   0xd   :  { %s402_s9 = scalar_lea.vmem %s33_s24, 128  ;;  %p407_p4 = scmp.lt.s32.totalorder %s33_s24, %s33_s24 }
   0xe   :  { %p403_p3 = scmp.ne.s32.totalorder %s33_s24, %s402_s9  ;;  %p408_p5 = scmp.lt.s32.totalorder %s402_s9, %s402_s9 }
  0x10   :  { %p409_p6 = por %p408_p5, %p407_p4 }
  0x12   :  { %p410_p7 = pnand %p409_p6, %p403_p3 }
  0x14   :  { %413 = shalt.err (!%p410_p7)
}
  0x15   :  { %35 = dma.hbm_to_vmem [thread:$0]  %s592_s1, 128, %s33_s24, [#allocation7]  }
  0x16   :  { %s414_s14 = scalar_lea.hbm %s591_s0, 128 }
  0x17   :  { %p415_p8 = scmp.ne.s32.totalorder %s591_s0, %s414_s14  ;;  %p418_p9 = scmp.lt.u32.totalorder %s414_s14, %s591_s0 }
  0x19   :  { %p420_p10 = pnand %p418_p9, %p415_p8 }
  0x1b   :  { %423 = shalt.err (!%p420_p10)
}
  0x1c   :  { %s424_s19 = scalar_lea.vmem %s23_s26, 128  ;;  %p429_p12 = scmp.lt.s32.totalorder %s23_s26, %s23_s26 }
  0x1d   :  { %p425_p11 = scmp.ne.s32.totalorder %s23_s26, %s424_s19  ;;  %p430_p13 = scmp.lt.s32.totalorder %s424_s19, %s424_s19 }
  0x1f   :  { %p431_p0 = por %p430_p13, %p429_p12 }
  0x21   :  { %p432_p1 = pnand %p431_p0, %p425_p11 }
  0x23   :  { %435 = shalt.err (!%p432_p1)
}
  0x24   :  { %25 = dma.hbm_to_vmem [thread:$0]  %s591_s0, 128, %s23_s26, [#allocation4]  }
  0x25   :  { %s488_s21 = smov [#allocation8]   ;;  %s436_s25 = scalar_lea.hbm %s593_s2, 512 }
  0x26   :  { %s41_s22 = sshll.u32 %s488_s21, 4  ;;  %p437_p2 = scmp.ne.s32.totalorder %s593_s2, %s436_s25  ;;  %s42_s22 = int_to_ptr.vmem [resolvable:$true] %s41_s22 }
  0x27   :  { %p440_p3 = scmp.lt.u32.totalorder %s436_s25, %s593_s2 }
  0x29   :  { %p442_p4 = pnand %p440_p3, %p437_p2 }
  0x2b   :  { %445 = shalt.err (!%p442_p4)
}
  0x2c   :  { %s446_s7 = scalar_lea.vmem %s42_s22, 512  ;;  %p451_p6 = scmp.lt.s32.totalorder %s42_s22, %s42_s22 }
  0x2d   :  { %p447_p5 = scmp.ne.s32.totalorder %s42_s22, %s446_s7  ;;  %p452_p7 = scmp.lt.s32.totalorder %s446_s7, %s446_s7 }
  0x2f   :  { %p453_p8 = por %p452_p7, %p451_p6 }
  0x31   :  { %p454_p9 = pnand %p453_p8, %p447_p5 }
  0x33   :  { %457 = shalt.err (!%p454_p9)
}
  0x34   :  { %s489_s0 = smov 128   ;;  %s490_s26 = smov 8  }
  0x35   :  { %47 = dma.hbm_to_vmem [thread:$0]  %s593_s2, 512, %s42_s22, [#allocation7], %s489_s0, %s489_s0, %s490_s26  }
  0x36   :  { %480 = dma.done.wait [#allocation4], 128  }
  0x37   :  { %481 = vsyncadd [#allocation4], 4294967168 }
  0x38   :  { %482 = dma.done.wait [#allocation7], 640  }
  0x39   :  { %483 = vsyncadd [#allocation7], 4294966656  ;;  %v491_v1 = vmov 0.0|0.0   ;;  %vm492_vm0 = vmmov 0   ;;  %v493_v2 = vmov 0.0   ;;  %v63_v3 = vld [vmem:[#allocation8] sm:$0xff] }
  0x3a   :  { %359 = vmatprep.subr.bf16.mxu0 %v491_v1  ;;  %365 = vmatprep.subr.bf16.mxu1 %v491_v1  ;;  %v64_v4 = vld [vmem:[#allocation8 + $0x8] sm:$0xff]  ;;  %v65_v5 = vld [vmem:[#allocation8 + $0x10] sm:$0xff]  ;;  %v66_v7 = vld [vmem:[#allocation8 + $0x18] sm:$0xff]  ;;  %vm77_vm1 = vcmask 261120   ;;  %vm282_vm4 = vcmask 7168  }
  0x3b   :  { %345 = vmatprep.mubr.msk.f32.mxu0 %vm492_vm0, %v493_v2  ;;  %356 = vmatprep.mubr.msk.f32.mxu1 %vm492_vm0, %v493_v2  ;;  %v360_v6 = vpack.c.bf16 %v64_v4, %v63_v3  ;;  %v363_v8 = vpack.c.bf16 %v66_v7, %v65_v5  ;;  %v70_v9 = vld [vmem:[#allocation3] sm:$0xff]  ;;  %v186_v10 = vld [vmem:[#allocation6] sm:$0xff]  ;;  %v322_v11 = vld [vmem:[%s594_s3] ss:$0 sm:$0xff] }
  0x3c   :  { %v324_v18 = vld [vmem:[%s595_s4] ss:$0 sm:$0xff]  ;;  %s494_s4 = smov [#allocation9]  }
  0x3d   :  { %361 = vmatpush3.bf16.msra.mxu0 %v360_v6  ;;  %367 = vmatpush3.bf16.msra.mxu1 %v360_v6  ;;  %v325_v25 = vld [vmem:[#allocation2] ss:$0 sm:$0xff]  ;;  %s312_s12 = sshll.u32 %s494_s4, 4  ;;  %s313_s12 = int_to_ptr.vmem [resolvable:$true] %s312_s12 }
  0x3e   :  { %362 = vmatprep.subr.bf16.mxu0 %v491_v1  ;;  %368 = vmatprep.subr.bf16.mxu1 %v491_v1  ;;  %s458_s15 = scalar_lea.vmem %s313_s12, 16  ;;  %s462_s16 = scalar_lea.vmem %s313_s12, 32 }
  0x3f   :  { %p459_p10 = scmp.ne.s32.totalorder %s313_s12, %s458_s15  ;;  %p463_p11 = scmp.lt.s32.totalorder %s313_s12, %s313_s12 }
  0x40   :  { %p464_p12 = scmp.lt.s32.totalorder %s462_s16, %s458_s15 }
  0x41   :  { %364 = vmatpush3.bf16.msra.mxu0 %v363_v8  ;;  %370 = vmatpush3.bf16.msra.mxu1 %v363_v8 }
  0x42   :  { %p465_p13 = por %p464_p12, %p463_p11 }
  0x44   :  { %346 = vmatmul.mubr.msk.f32.vlgmr.msra.gmra.mrb[0].mxu0 %vm77_vm1, %v70_v9  ;;  %357 = vmatmul.mubr.msk.f32.vlgmr.msra.gmra.mrb[0].mxu1 %vm77_vm1, %v186_v10  ;;  %p466_p0 = pnand %p465_p13, %p459_p10 }
 0x117   :  { %v147_v12 = vpop.f32.mrb[0].mxu0  ;;  %v256_v13 = vpop.f32.mrb[0].mxu1 }
 0x118   :  { %v148_v14 = vadd.f32 %v322_v11, %v147_v12  ;;  %v347_v15 = vpop.f32.mrb[1].mxu0  ;;  %v257_v16 = vadd.f32 %v322_v11, %v256_v13  ;;  %v358_v17 = vpop.f32.mrb[1].mxu1 }
 0x11a   :  { %v151_v19 = vmax.f32 %v148_v14, 0.0  ;;  %v260_v20 = vmax.f32 %v257_v16, 0.0 }
 0x11c   :  { %v158_v21 = vmul.f32 %v324_v18, %v151_v19  ;;  %v261_v22 = vmul.f32 %v324_v18, %v260_v20 }
 0x11e   :  { %v159_v23 = vsel %vm77_vm1, %v158_v21, 0.0  ;;  %v262_v24 = vsel %vm77_vm1, %v261_v22, 0.0 }
 0x11f   :  { %160 = vadd.xlane.f32.xlu0 %v159_v23 }
 0x123   :  { %263 = vadd.xlane.f32.xlu0 %v262_v24 }
 0x1ac   :  { %v161_v26 = vpop.xlane.xlu0 %160 }
 0x1ad   :  { %v168_v27 = vadd.f32 %v325_v25, %v161_v26 }
 0x1af   :  { %v169_v28 = vsub.f32 0.0, %v168_v27 }
 0x1b0   :  { %v264_v29 = vpop.xlane.xlu0 %263 }
 0x1b1   :  { %v171_v30 = vand.u32 2147483647, %v169_v28  ;;  %v265_v31 = vadd.f32 %v325_v25, %v264_v29  ;;  %v170_v51 = vmax.f32 %v169_v28, 0.0 }
 0x1b3   :  { %v172_v32 = vsub.f32 0.0, %v171_v30  ;;  %v267_v33 = vand.u32 2147483647, %v265_v31  ;;  %v266_v55 = vmax.f32 %v265_v31, 0.0 }
 0x1b5   :  { %v173_v34 = vmul.f32 1.442695, %v172_v32  ;;  %v268_v35 = vsub.f32 0.0, %v267_v33 }
 0x1b7   :  { %384 = vpow2.f32 %v173_v34  ;;  %v269_v36 = vmul.f32 1.442695, %v268_v35 }
 0x1b9   :  { %386 = vpow2.f32 %v269_v36 }
 0x1c1   :  { %v385_v37 = vpop.eup %384 }
 0x1c2   :  { %v175_v38 = vadd.f32 1.0, %v385_v37  ;;  %v178_v41 = vmul.f32 -0.5, %v385_v37  ;;  %v181_v44 = vand.u32 2147483647, %v385_v37 }
 0x1c3   :  { %v387_v39 = vpop.eup %386 }
 0x1c4   :  { %388 = vlog2.f32 %v175_v38  ;;  %v271_v40 = vadd.f32 1.0, %v387_v39  ;;  %v274_v42 = vmul.f32 -0.5, %v387_v39  ;;  %v179_v43 = vadd.f32 1.0, %v178_v41 }
 0x1c5   :  { %v277_v47 = vand.u32 2147483647, %v387_v39  ;;  %vm182_vm2 = vcmp.lt.f32.partialorder %v181_v44, 0.0004427343 }
 0x1c6   :  { %390 = vlog2.f32 %v271_v40  ;;  %v275_v45 = vadd.f32 1.0, %v274_v42  ;;  %v180_v49 = vmul.f32 %v385_v37, %v179_v43 }
 0x1c7   :  { %vm278_vm3 = vcmp.lt.f32.partialorder %v277_v47, 0.0004427343 }
 0x1c8   :  { %v276_v54 = vmul.f32 %v387_v39, %v275_v45 }
 0x1ce   :  { %v389_v46 = vpop.eup %388 }
 0x1cf   :  { %v177_v48 = vmul.f32 0.6931472, %v389_v46 }
 0x1d0   :  { %v391_v50 = vpop.eup %390 }
 0x1d1   :  { %v183_v52 = vsel %vm182_vm2, %v180_v49, %v177_v48  ;;  %v273_v53 = vmul.f32 0.6931472, %v391_v50 }
 0x1d2   :  { %v184_v56 = vadd.f32 %v183_v52, %v170_v51 }
 0x1d3   :  { %v279_v57 = vsel %vm278_vm3, %v276_v54, %v273_v53 }
 0x1d4   :  { %v185_v58 = vmin.f32 %v184_v56, 100.0  ;;  %v280_v59 = vadd.f32 %v279_v57, %v266_v55 }
 0x1d6   :  { %v283_v60 = vsel %vm282_vm4, %v185_v58, 0.0  ;;  %v281_v61 = vmin.f32 %v280_v59, 100.0 }
 0x1d7   :  { %284 = vadd.xlane.f32.xlu1 %v283_v60 }
 0x1d8   :  { %v293_v62 = vsel %vm282_vm4, %v281_v61, 0.0 }
 0x1db   :  { %294 = vadd.xlane.f32.xlu1 %v293_v62 }
 0x264   :  { %v285_v63 = vpop.xlane.xlu1 %284 }
 0x265   :  { %v286_v0 = vrot.slane %v285_v63, 4 }
 0x267   :  { %v287_v1 = vadd.f32 %v286_v0, %v285_v63 }
 0x268   :  { %v295_v2 = vpop.xlane.xlu1 %294 }
 0x269   :  { %v288_v3 = vrot.slane %v287_v1, 2  ;;  %v296_v4 = vrot.slane %v295_v2, 4 }
 0x26b   :  { %v297_v5 = vadd.f32 %v296_v4, %v295_v2  ;;  %v289_v6 = vadd.f32 %v288_v3, %v287_v1 }
 0x26d   :  { %v298_v7 = vrot.slane %v297_v5, 2  ;;  %v290_v8 = vrot.slane %v289_v6, 1 }
 0x26f   :  { %v299_v9 = vadd.f32 %v298_v7, %v297_v5  ;;  %v291_v10 = vadd.f32 %v290_v8, %v289_v6 }
 0x271   :  { %371 = vpush %v291_v10  ;;  %v300_v11 = vrot.slane %v299_v9, 1 }
 0x273   :  { %v301_v12 = vadd.f32 %v300_v11, %v299_v9 }
 0x275   :  { %373 = vpush %v301_v12 }
 0x2a2   :  { %s372_s3 = spop %371 }
 0x2a6   :  { %s374_s13 = spop %373 }
 0x2a7   :  { %s303_s14 = sadd.f32 %s374_s13, %s372_s3 }
 0x2a9   :  { %v304_v13 = vstv %s303_s14 }
 0x2aa   :  { %305 = vst [vmem:[#allocation9] sm:$0x1] %v304_v13 }
 0x2ab   :  { %469 = shalt.err (!%p466_p0)
}
 0x2ac   :  { %s470_s19 = scalar_lea.hbm %s597_s6, 16 }
 0x2ad   :  { %p471_p1 = scmp.ne.s32.totalorder %s597_s6, %s470_s19  ;;  %p474_p2 = scmp.lt.u32.totalorder %s470_s19, %s597_s6 }
 0x2af   :  { %p476_p3 = pnand %p474_p2, %p471_p1 }
 0x2b1   :  { %479 = shalt.err (!%p476_p3)
}
 0x2b2   :  { %315 = dma.vmem_to_hbm [thread:$0]  %s313_s12, 16, %s597_s6, [#allocation5]  }
 0x2b3   :  { %484 = dma.done.wait [#allocation5], 16  }
 0x2b4   :  { %485 = vsyncadd [#allocation5], 4294967280 }
 0x2b5   :  { %319 = vsyncpa [#allocation4], 1 }
 0x2b6   :  { %320 = vsyncpa [#allocation7], 1 }
 0x2b7   :  { %321 = vsyncpa [#allocation5], 1 }

</bundles_post_ra>
